<compile_context>
chip_gen: v6e
topology: v6e:2x2x1
jax: 0.10.0
libtpu: 0.0.40
codegen_flags: <defaults>
</compile_context>

<pallas_src>
import functools

import jax
import jax.numpy as jnp
from jax.experimental import pallas as pl
from jax.experimental.pallas import tpu as pltpu


def ncf_kernel(u_gmf_ref, b_gmf_ref, u_mlp_ref, b_mlp_ref,
               w1_ref, b1_ref, w2_ref, b2_ref, wfc_ref, bfc_ref,
               out_ref):
    # GMF tower: pure VPU elementwise mul (f32).
    h_gmf = u_gmf_ref[...] * b_gmf_ref[...]                              # (TB, D)

    # MLP tower: lane-concat -> one K=2D MXU dot -> ReLU -> K=H MXU dot.
    x_mlp = jnp.concatenate([u_mlp_ref[...], b_mlp_ref[...]], axis=-1)   # (TB, 2D)
    h1 = jnp.dot(x_mlp, w1_ref[...],
                 preferred_element_type=jnp.float32) + b1_ref[...]       # (TB, H)
    h1 = jnp.maximum(h1, 0.0)
    h_mlp = jnp.dot(h1.astype(w2_ref.dtype), w2_ref[...],
                    preferred_element_type=jnp.float32) + b2_ref[...]    # (TB, D)

    # Final FC (2D -> 1): broadcast-mul + lane reduce instead of an N=1 matmul.
    h = jnp.concatenate([h_gmf, h_mlp], axis=-1)                         # (TB, 2D)
    logits = jnp.sum(h * wfc_ref[...], axis=-1, keepdims=True) + bfc_ref[...]
    out_ref[...] = jax.nn.sigmoid(logits)                                # (TB, 1)


def _round_up(x, m):
    return ((x + m - 1) // m) * m


@functools.partial(jax.jit, static_argnames=("mxu_dtype",))
def bundle_ncf_forward(params, u, b, mxu_dtype=jnp.float32):
    """u: (B, 1) int32 user ids; b: (B, K) int32 bundle item ids -> (B, 1) f32."""
    # --- plain-JAX glue: embedding gathers + bundle mean (fused by XLA) ---
    # TODO(synk): fuse the embedding gathers into the kernel (scalar-prefetched
    # ids + manual DMA gather) to remove the extra HBM round trip of the
    # gathered rows — the biggest remaining win for this memory-bound model.
    u_ids = u[:, 0]
    u_gmf = jnp.take(params["user_embed_gmf"], u_ids, axis=0)                   # (B, D)
    u_mlp = jnp.take(params["user_embed_mlp"], u_ids, axis=0)                   # (B, D)
    b_gmf = jnp.mean(jnp.take(params["item_embed_gmf"], b, axis=0), axis=1)     # (B, D)
    b_mlp = jnp.mean(jnp.take(params["item_embed_mlp"], b, axis=0), axis=1)     # (B, D)

    B, D = u_gmf.shape
    H = params["w1"].shape[1]

    # Optional reduced-precision MXU path (keep f32 GMF/mean and f32 accumulate).
    u_mlp = u_mlp.astype(mxu_dtype)
    b_mlp = b_mlp.astype(mxu_dtype)
    w1 = params["w1"].astype(mxu_dtype)                                         # (2D, H)
    w2 = params["w2"].astype(mxu_dtype)                                         # (H, D)

    b1 = params["b1"].reshape(1, H)
    b2 = params["b2"].reshape(1, D)
    wfc_row = params["wfc"].reshape(1, 2 * D)   # (2D,1) -> (1,2D): free reshape
    bfc = params["bfc"].reshape(1, 1)

    # Batch tiling: fill the MXU M dimension when B is large; pad small B up to
    # a sublane multiple. (TB=256 targets the v6e/v7x 2x256 MXU; still fine on
    # v5e where it is two full 128-row passes.)
    TB = 256 if B >= 256 else _round_up(B, 8)
    Bp = _round_up(B, TB)
    if Bp != B:
        pad = ((0, Bp - B), (0, 0))
        u_gmf = jnp.pad(u_gmf, pad)
        b_gmf = jnp.pad(b_gmf, pad)
        u_mlp = jnp.pad(u_mlp, pad)
        b_mlp = jnp.pad(b_mlp, pad)

    act_spec = pl.BlockSpec((TB, D), lambda i: (i, 0))

    def w_spec(shape):
        # Weight blocks: constant block index -> loaded once, VMEM-resident.
        return pl.BlockSpec(shape, lambda i: (0, 0))

    out = pl.pallas_call(
        ncf_kernel,
        out_shape=jax.ShapeDtypeStruct((Bp, 1), jnp.float32),
        grid=(Bp // TB,),
        in_specs=[
            act_spec,               # u_gmf   (TB, D)
            act_spec,               # b_gmf   (TB, D)
            act_spec,               # u_mlp   (TB, D)
            act_spec,               # b_mlp   (TB, D)
            w_spec((2 * D, H)),     # w1
            w_spec((1, H)),         # b1
            w_spec((H, D)),         # w2
            w_spec((1, D)),         # b2
            w_spec((1, 2 * D)),     # wfc as a lane row
            w_spec((1, 1)),         # bfc
        ],
        out_specs=pl.BlockSpec((TB, 1), lambda i: (i, 0)),
        compiler_params=pltpu.CompilerParams(
            dimension_semantics=("parallel",)),
    )(u_gmf, b_gmf, u_mlp, b_mlp, w1, b1, w2, b2, wfc_row, bfc)

    return out[:B]


def init_params(key, n_user, n_item, embed_dim=32, hidden_dim=128):
    ks = jax.random.split(key, 10)

    def xavier_normal(k, shape):
        std = (2.0 / (shape[0] + shape[1])) ** 0.5
        return std * jax.random.normal(k, shape, dtype=jnp.float32)

    def linear_init(kw, kb, fan_in, fan_out):
        bound = 1.0 / (fan_in ** 0.5)
        w = jax.random.uniform(kw, (fan_in, fan_out), jnp.float32, -bound, bound)
        b = jax.random.uniform(kb, (fan_out,), jnp.float32, -bound, bound)
        return w, b

    w1, b1 = linear_init(ks[4], ks[5], 2 * embed_dim, hidden_dim)
    w2, b2 = linear_init(ks[6], ks[7], hidden_dim, embed_dim)
    wfc, bfc = linear_init(ks[8], ks[9], 2 * embed_dim, 1)

    return dict(
        user_embed_gmf=xavier_normal(ks[0], (n_user, embed_dim)),
        item_embed_gmf=xavier_normal(ks[1], (n_item, embed_dim)),
        user_embed_mlp=xavier_normal(ks[2], (n_user, embed_dim)),
        item_embed_mlp=xavier_normal(ks[3], (n_item, embed_dim)),
        w1=w1, b1=b1, w2=w2, b2=b2, wfc=wfc, bfc=bfc,
    )


def reference_forward(params, u, b):
    """Pure-JAX reference mirroring the PyTorch forward."""
    u_ids = u[:, 0]
    u_gmf = params["user_embed_gmf"][u_ids]
    b_gmf = jnp.mean(params["item_embed_gmf"][b], axis=1)
    h_gmf = u_gmf * b_gmf
    u_mlp = params["user_embed_mlp"][u_ids]
    b_mlp = jnp.mean(params["item_embed_mlp"][b], axis=1)
    h_mlp = jnp.concatenate([u_mlp, b_mlp], axis=-1)
    h_mlp = jnp.maximum(h_mlp @ params["w1"] + params["b1"], 0.0)
    h_mlp = h_mlp @ params["w2"] + params["b2"]
    h = jnp.concatenate([h_gmf, h_mlp], axis=-1)
    logits = h @ params["wfc"] + params["bfc"]
    return jax.nn.sigmoid(logits)


if __name__ == "__main__":
    key = jax.random.PRNGKey(0)
    n_user, n_item = 50, 40
    embed_dim, hidden_dim = 32, 128
    B, K = 8, 4          # batch size, bundle size

    pkey, ukey, bkey = jax.random.split(key, 3)
    params = init_params(pkey, n_user, n_item, embed_dim, hidden_dim)

    u = jax.random.randint(ukey, (B, 1), 0, n_user, dtype=jnp.int32)
    b = jax.random.randint(bkey, (B, K), 0, n_item, dtype=jnp.int32)

    out = bundle_ncf_forward(params, u, b)
    out = jax.block_until_ready(out)

    ref = reference_forward(params, u, b)
    assert out.shape == (B, 1)
    assert jnp.allclose(out, ref, atol=1e-5, rtol=1e-5), (out, ref)

    # Exercise the batch-padding path (B not a multiple of the sublane tile).
    out5 = jax.block_until_ready(bundle_ncf_forward(params, u[:5], b[:5]))
    assert out5.shape == (5, 1)
    assert jnp.allclose(out5, ref[:5], atol=1e-5, rtol=1e-5), (out5, ref[:5])

    print("KERNEL_OK")
</pallas_src>

<mosaic_0001>
module attributes {stable_mosaic.version = 11 : i64} {
  func.func @ncf_kernel(%arg0: i32, %arg1: memref<8x32xf32, #tpu.memory_space<vmem>>, %arg2: memref<8x32xf32, #tpu.memory_space<vmem>>, %arg3: memref<8x32xf32, #tpu.memory_space<vmem>>, %arg4: memref<8x32xf32, #tpu.memory_space<vmem>>, %arg5: memref<64x128xf32, #tpu.memory_space<vmem>>, %arg6: memref<1x128xf32, #tpu.memory_space<vmem>>, %arg7: memref<128x32xf32, #tpu.memory_space<vmem>>, %arg8: memref<1x32xf32, #tpu.memory_space<vmem>>, %arg9: memref<1x64xf32, #tpu.memory_space<vmem>>, %arg10: memref<1x1xf32, #tpu.memory_space<vmem>>, %arg11: memref<8x1xf32, #tpu.memory_space<vmem>>) attributes {dimension_semantics = [#tpu.dimension_semantics<parallel>], iteration_bounds = array<i64: 1>, scalar_prefetch = 0 : i64, scratch_operands = 0 : i64, tpu.core_type = #tpu.core_type<tc>, window_params = [{transform_indices = @transform_0, window_bounds = array<i64: 8, 32>}, {transform_indices = @transform_1, window_bounds = array<i64: 8, 32>}, {transform_indices = @transform_2, window_bounds = array<i64: 8, 32>}, {transform_indices = @transform_3, window_bounds = array<i64: 8, 32>}, {pipeline_mode = #tpu.pipeline_mode<synchronous>, transform_indices = @transform_4, window_bounds = array<i64: 64, 128>}, {pipeline_mode = #tpu.pipeline_mode<synchronous>, transform_indices = @transform_5, window_bounds = array<i64: 1, 128>}, {pipeline_mode = #tpu.pipeline_mode<synchronous>, transform_indices = @transform_6, window_bounds = array<i64: 128, 32>}, {pipeline_mode = #tpu.pipeline_mode<synchronous>, transform_indices = @transform_7, window_bounds = array<i64: 1, 32>}, {pipeline_mode = #tpu.pipeline_mode<synchronous>, transform_indices = @transform_8, window_bounds = array<i64: 1, 64>}, {pipeline_mode = #tpu.pipeline_mode<synchronous>, transform_indices = @transform_9, window_bounds = array<i64: 1, 1>}, {transform_indices = @transform_10, window_bounds = array<i64: 8, 1>}]} {
    %c0 = arith.constant 0 : index
    %c0_0 = arith.constant 0 : index
    %0 = vector.load %arg1[%c0, %c0_0] : memref<8x32xf32, #tpu.memory_space<vmem>>, vector<8x32xf32>
    %c0_1 = arith.constant 0 : index
    %c0_2 = arith.constant 0 : index
    %1 = vector.load %arg2[%c0_1, %c0_2] : memref<8x32xf32, #tpu.memory_space<vmem>>, vector<8x32xf32>
    %2 = arith.mulf %0, %1 : vector<8x32xf32>
    %c0_3 = arith.constant 0 : index
    %c0_4 = arith.constant 0 : index
    %3 = vector.load %arg3[%c0_3, %c0_4] : memref<8x32xf32, #tpu.memory_space<vmem>>, vector<8x32xf32>
    %c0_5 = arith.constant 0 : index
    %c0_6 = arith.constant 0 : index
    %4 = vector.load %arg4[%c0_5, %c0_6] : memref<8x32xf32, #tpu.memory_space<vmem>>, vector<8x32xf32>
    %5 = tpu.concatenate %3, %4 in 1 : vector<8x32xf32>, vector<8x32xf32> -> vector<8x64xf32>
    %c0_7 = arith.constant 0 : index
    %c0_8 = arith.constant 0 : index
    %6 = vector.load %arg5[%c0_7, %c0_8] : memref<64x128xf32, #tpu.memory_space<vmem>>, vector<64x128xf32>
    %cst = arith.constant dense<0.000000e+00> : vector<8x128xf32>
    %7 = tpu.matmul %5, %6, %cst {dimension_numbers = #tpu.dot_dimension_numbers<[1], [0], [0], [1], [0, 0, 1, 1], [], []>} : vector<8x64xf32>, vector<64x128xf32>, vector<8x128xf32> -> vector<8x128xf32>
    %c0_9 = arith.constant 0 : index
    %c0_10 = arith.constant 0 : index
    %8 = vector.load %arg6[%c0_9, %c0_10] : memref<1x128xf32, #tpu.memory_space<vmem>>, vector<1x128xf32>
    %9 = vector.broadcast %8 : vector<1x128xf32> to vector<8x128xf32>
    %10 = arith.addf %7, %9 : vector<8x128xf32>
    %cst_11 = arith.constant 0.000000e+00 : f32
    %11 = vector.broadcast %cst_11 : f32 to vector<8x128xf32>
    %12 = arith.maximumf %10, %11 : vector<8x128xf32>
    %c0_12 = arith.constant 0 : index
    %c0_13 = arith.constant 0 : index
    %13 = vector.load %arg7[%c0_12, %c0_13] : memref<128x32xf32, #tpu.memory_space<vmem>>, vector<128x32xf32>
    %cst_14 = arith.constant dense<0.000000e+00> : vector<8x32xf32>
    %14 = tpu.matmul %12, %13, %cst_14 {dimension_numbers = #tpu.dot_dimension_numbers<[1], [0], [0], [1], [0, 0, 1, 1], [], []>} : vector<8x128xf32>, vector<128x32xf32>, vector<8x32xf32> -> vector<8x32xf32>
    %c0_15 = arith.constant 0 : index
    %c0_16 = arith.constant 0 : index
    %15 = vector.load %arg8[%c0_15, %c0_16] : memref<1x32xf32, #tpu.memory_space<vmem>>, vector<1x32xf32>
    %16 = vector.broadcast %15 : vector<1x32xf32> to vector<8x32xf32>
    %17 = arith.addf %14, %16 : vector<8x32xf32>
    %18 = tpu.concatenate %2, %17 in 1 : vector<8x32xf32>, vector<8x32xf32> -> vector<8x64xf32>
    %c0_17 = arith.constant 0 : index
    %c0_18 = arith.constant 0 : index
    %19 = vector.load %arg9[%c0_17, %c0_18] : memref<1x64xf32, #tpu.memory_space<vmem>>, vector<1x64xf32>
    %20 = vector.broadcast %19 : vector<1x64xf32> to vector<8x64xf32>
    %21 = arith.mulf %18, %20 : vector<8x64xf32>
    %cst_19 = arith.constant dense<0.000000e+00> : vector<8xf32>
    %22 = vector.multi_reduction <add>, %21, %cst_19 [1] : vector<8x64xf32> to vector<8xf32>
    %23 = vector.shape_cast %22 : vector<8xf32> to vector<8x1xf32>
    %c0_20 = arith.constant 0 : index
    %c0_21 = arith.constant 0 : index
    %24 = vector.load %arg10[%c0_20, %c0_21] : memref<1x1xf32, #tpu.memory_space<vmem>>, vector<1x1xf32>
    %25 = vector.broadcast %24 : vector<1x1xf32> to vector<8x1xf32>
    %26 = arith.addf %23, %25 : vector<8x1xf32>
    %27 = arith.negf %26 : vector<8x1xf32>
    %28 = math.exp %27 : vector<8x1xf32>
    %cst_22 = arith.constant 1.000000e+00 : f32
    %29 = vector.broadcast %cst_22 : f32 to vector<8x1xf32>
    %30 = arith.addf %29, %28 : vector<8x1xf32>
    %31 = arith.divf %29, %30 : vector<8x1xf32>
    %c0_23 = arith.constant 0 : index
    %c0_24 = arith.constant 0 : index
    %32 = vector.load %arg11[%c0_23, %c0_24] : memref<8x1xf32, #tpu.memory_space<vmem>>, vector<8x1xf32>
    tpu.vector_store %arg11[%c0_23, %c0_24], %31 {strides = array<i32>} : memref<8x1xf32, #tpu.memory_space<vmem>>, vector<8x1xf32>,
    return
  }
  func.func @transform_0(%arg0: i32) -> (i32, i32) {
    %c0_i32 = arith.constant 0 : i32
    %c0_i32_0 = arith.constant 0 : i32
    return %arg0, %c0_i32 : i32, i32
  }
  func.func @transform_1(%arg0: i32) -> (i32, i32) {
    %c0_i32 = arith.constant 0 : i32
    %c0_i32_0 = arith.constant 0 : i32
    return %arg0, %c0_i32 : i32, i32
  }
  func.func @transform_2(%arg0: i32) -> (i32, i32) {
    %c0_i32 = arith.constant 0 : i32
    %c0_i32_0 = arith.constant 0 : i32
    return %arg0, %c0_i32 : i32, i32
  }
  func.func @transform_3(%arg0: i32) -> (i32, i32) {
    %c0_i32 = arith.constant 0 : i32
    %c0_i32_0 = arith.constant 0 : i32
    return %arg0, %c0_i32 : i32, i32
  }
  func.func @transform_4(%arg0: i32) -> (i32, i32) {
    %c0_i32 = arith.constant 0 : i32
    %c0_i32_0 = arith.constant 0 : i32
    %c0_i32_1 = arith.constant 0 : i32
    return %c0_i32, %c0_i32_0 : i32, i32
  }
  func.func @transform_5(%arg0: i32) -> (i32, i32) {
    %c0_i32 = arith.constant 0 : i32
    %c0_i32_0 = arith.constant 0 : i32
    %c0_i32_1 = arith.constant 0 : i32
    return %c0_i32, %c0_i32_0 : i32, i32
  }
  func.func @transform_6(%arg0: i32) -> (i32, i32) {
    %c0_i32 = arith.constant 0 : i32
    %c0_i32_0 = arith.constant 0 : i32
    %c0_i32_1 = arith.constant 0 : i32
    return %c0_i32, %c0_i32_0 : i32, i32
  }
  func.func @transform_7(%arg0: i32) -> (i32, i32) {
    %c0_i32 = arith.constant 0 : i32
    %c0_i32_0 = arith.constant 0 : i32
    %c0_i32_1 = arith.constant 0 : i32
    return %c0_i32, %c0_i32_0 : i32, i32
  }
  func.func @transform_8(%arg0: i32) -> (i32, i32) {
    %c0_i32 = arith.constant 0 : i32
    %c0_i32_0 = arith.constant 0 : i32
    %c0_i32_1 = arith.constant 0 : i32
    return %c0_i32, %c0_i32_0 : i32, i32
  }
  func.func @transform_9(%arg0: i32) -> (i32, i32) {
    %c0_i32 = arith.constant 0 : i32
    %c0_i32_0 = arith.constant 0 : i32
    %c0_i32_1 = arith.constant 0 : i32
    return %c0_i32, %c0_i32_0 : i32, i32
  }
  func.func @transform_10(%arg0: i32) -> (i32, i32) {
    %c0_i32 = arith.constant 0 : i32
    %c0_i32_0 = arith.constant 0 : i32
    return %arg0, %c0_i32 : i32, i32
  }
}

</mosaic_0001>

<bundles_post_ra>
// kernel: bundle_ncf_forward.1
= control target key start
LH: loop header
LB: loop body
LE: loop exit
PB: predicated region body
PF: predicated region fallthrough
CT: control target
= control target key end

     0   :  { %v360_v1 = vmov 0.0   ;;  %vm361_vm0 = vmmov 0   ;;  %s362_s19 = smov 32   ;;  %vm46_vm1 = vcmask 261120   ;;  %vm63_vm2 = vcmask 523264   ;;  %s549_s3 = inlined_call_operand.vmem [shape: f32[8,32], index: 3, kind: input, shape index: {}]   ;;  %s550_s4 = inlined_call_operand.vmem [shape: f32[64,128], index: 4, kind: input, shape index: {}]   ;;  %s551_s6 = inlined_call_operand.vmem [shape: f32[128,32], index: 6, kind: input, shape index: {}]   ;;  %s552_s2 = inlined_call_operand.vmem [shape: f32[8,32], index: 2, kind: input, shape index: {}]   ;;  %s553_s5 = inlined_call_operand.vmem [shape: f32[1,128], index: 5, kind: input, shape index: {}]   ;;  %s554_s9 = inlined_call_operand.<no memory space> [shape: f32[1,1], index: 9, kind: input, shape index: {}]   ;;  %s555_s7 = inlined_call_operand.vmem [shape: f32[1,32], index: 7, kind: input, shape index: {}]   ;;  %s556_s0 = inlined_call_operand.vmem [shape: f32[8,32], index: 0, kind: input, shape index: {}]   ;;  %s557_s1 = inlined_call_operand.vmem [shape: f32[8,32], index: 1, kind: input, shape index: {}]   ;;  %s558_s8 = inlined_call_operand.vmem [shape: f32[1,64], index: 8, kind: input, shape index: {}]   ;;  %s559_s10 = inlined_call_operand.vmem [shape: f32[8,1], index: 10, kind: output, shape index: {}]  }
   0x1   :  { %v41_v0 = vld [vmem:[%s549_s3] sm:$0xff]  ;;  %299 = vmatprep.subr.mxu0 %v360_v1  ;;  %v55_v2 = vld [vmem:[%s550_s4 + $0x38] sm:$0xff]  ;;  %v54_v3 = vld [vmem:[%s550_s4 + $0x30] sm:$0xff]  ;;  %315 = vmatprep.mubr.msk.f32.mxu0 %vm361_vm0, %v360_v1  ;;  %v15_v34 = vstv %s554_s9  ;;  %vm261_vm3 = vcmask 7168  }
   0x2   :  { %43 = vrot.lane.b32.xlu0 %v41_v0, %s362_s19  ;;  %300 = vmatpush3.msra.mxu0 %v55_v2  ;;  %v53_v4 = vld [vmem:[%s550_s4 + $0x28] sm:$0xff]  ;;  %v153_v5 = vld [vmem:[%s551_s6 + $0x78] sm:$0xff]  ;;  %v152_v6 = vld [vmem:[%s551_s6 + $0x70] sm:$0xff]  ;;  %16 = vst [vmem:[#allocation2] sm:$0x1] %v15_v34 }
   0x3   :  { %301 = vmatprep.subr.mxu0 %v360_v1  ;;  %318 = vmatprep.subr.mxu1 %v360_v1  ;;  %v52_v7 = vld [vmem:[%s550_s4 + $0x20] sm:$0xff]  ;;  %v151_v8 = vld [vmem:[%s551_s6 + $0x68] sm:$0xff]  ;;  %v51_v9 = vld [vmem:[%s550_s4 + $0x18] sm:$0xff] }
   0x4   :  { %302 = vmatpush3.msra.mxu0 %v54_v3  ;;  %350 = vmatprep.mubr.msk.f32.mxu1 %vm361_vm0, %v360_v1  ;;  %v150_v10 = vld [vmem:[%s551_s6 + $0x60] sm:$0xff]  ;;  %v50_v11 = vld [vmem:[%s550_s4 + $0x10] sm:$0xff]  ;;  %v149_v12 = vld [vmem:[%s551_s6 + $0x58] sm:$0xff] }
   0x5   :  { %303 = vmatprep.subr.mxu0 %v360_v1  ;;  %319 = vmatpush3.msra.mxu1 %v153_v5  ;;  %v49_v13 = vld [vmem:[%s550_s4 + $0x8] sm:$0xff]  ;;  %v148_v14 = vld [vmem:[%s551_s6 + $0x50] sm:$0xff]  ;;  %v48_v15 = vld [vmem:[%s550_s4] sm:$0xff] }
   0x6   :  { %304 = vmatpush3.msra.mxu0 %v53_v4  ;;  %320 = vmatprep.subr.mxu1 %v360_v1  ;;  %v147_v16 = vld [vmem:[%s551_s6 + $0x48] sm:$0xff]  ;;  %v146_v17 = vld [vmem:[%s551_s6 + $0x40] sm:$0xff]  ;;  %v145_v18 = vld [vmem:[%s551_s6 + $0x38] sm:$0xff] }
   0x7   :  { %305 = vmatprep.subr.mxu0 %v360_v1  ;;  %321 = vmatpush3.msra.mxu1 %v152_v6  ;;  %v144_v19 = vld [vmem:[%s551_s6 + $0x30] sm:$0xff]  ;;  %v143_v20 = vld [vmem:[%s551_s6 + $0x28] sm:$0xff]  ;;  %v142_v21 = vld [vmem:[%s551_s6 + $0x20] sm:$0xff] }
   0x8   :  { %306 = vmatpush3.msra.mxu0 %v52_v7  ;;  %322 = vmatprep.subr.mxu1 %v360_v1  ;;  %v141_v22 = vld [vmem:[%s551_s6 + $0x18] sm:$0xff]  ;;  %v40_v23 = vld [vmem:[%s552_s2] sm:$0xff]  ;;  %v140_v26 = vld [vmem:[%s551_s6 + $0x10] sm:$0xff] }
   0x9   :  { %307 = vmatprep.subr.mxu0 %v360_v1  ;;  %323 = vmatpush3.msra.mxu1 %v151_v8  ;;  %v139_v27 = vld [vmem:[%s551_s6 + $0x8] sm:$0xff]  ;;  %v138_v28 = vld [vmem:[%s551_s6] sm:$0xff] }
   0xa   :  { %308 = vmatpush3.msra.mxu0 %v51_v9  ;;  %324 = vmatprep.subr.mxu1 %v360_v1  ;;  %v267_v29 = vld [vmem:[%s553_s5] ss:$0 sm:$0xff] }
   0xb   :  { %309 = vmatprep.subr.mxu0 %v360_v1  ;;  %325 = vmatpush3.msra.mxu1 %v150_v10  ;;  %v269_v35 = vld [vmem:[%s555_s7] ss:$0 sm:$0xff] }
   0xc   :  { %310 = vmatpush3.msra.mxu0 %v50_v11  ;;  %326 = vmatprep.subr.mxu1 %v360_v1  ;;  %v37_v39 = vld [vmem:[%s556_s0] sm:$0xff] }
   0xd   :  { %311 = vmatprep.subr.mxu0 %v360_v1  ;;  %327 = vmatpush3.msra.mxu1 %v149_v12  ;;  %v38_v40 = vld [vmem:[%s557_s1] sm:$0xff] }
   0xe   :  { %312 = vmatpush3.msra.mxu0 %v49_v13  ;;  %328 = vmatprep.subr.mxu1 %v360_v1  ;;  %v39_v41 = vmul.f32 %v38_v40, %v37_v39  ;;  %v270_v42 = vld [vmem:[%s558_s8] ss:$0 sm:$0xff] }
   0xf   :  { %313 = vmatprep.subr.mxu0 %v360_v1  ;;  %329 = vmatpush3.msra.mxu1 %v148_v14  ;;  %v271_v47 = vld [vmem:[#allocation2] ss:$0 sm:$0xff] }
  0x10   :  { %314 = vmatpush3.msra.mxu0 %v48_v15  ;;  %330 = vmatprep.subr.mxu1 %v360_v1 }
  0x11   :  { %331 = vmatpush3.msra.mxu1 %v147_v16 }
  0x12   :  { %332 = vmatprep.subr.mxu1 %v360_v1 }
  0x13   :  { %333 = vmatpush3.msra.mxu1 %v146_v17 }
  0x14   :  { %334 = vmatprep.subr.mxu1 %v360_v1 }
  0x15   :  { %335 = vmatpush3.msra.mxu1 %v145_v18 }
  0x16   :  { %336 = vmatprep.subr.mxu1 %v360_v1 }
  0x17   :  { %337 = vmatpush3.msra.mxu1 %v144_v19 }
  0x18   :  { %338 = vmatprep.subr.mxu1 %v360_v1 }
  0x19   :  { %339 = vmatpush3.msra.mxu1 %v143_v20 }
  0x1a   :  { %340 = vmatprep.subr.mxu1 %v360_v1 }
  0x1b   :  { %341 = vmatpush3.msra.mxu1 %v142_v21 }
  0x1c   :  { %342 = vmatprep.subr.mxu1 %v360_v1 }
  0x1d   :  { %343 = vmatpush3.msra.mxu1 %v141_v22 }
  0x1e   :  { %344 = vmatprep.subr.mxu1 %v360_v1 }
  0x1f   :  { %345 = vmatpush3.msra.mxu1 %v140_v26 }
  0x20   :  { %346 = vmatprep.subr.mxu1 %v360_v1 }
  0x21   :  { %347 = vmatpush3.msra.mxu1 %v139_v27 }
  0x22   :  { %348 = vmatprep.subr.mxu1 %v360_v1 }
  0x23   :  { %349 = vmatpush3.msra.mxu1 %v138_v28 }
  0x74   :  { %v44_v24 = vpop.permute.xlu0 %43 }
  0x75   :  { %v47_v25 = vsel %vm46_vm1, %v40_v23, %v44_v24 }
  0x76   :  { %316 = vmatmul.mubr.msk.f32.vlgmr.msra.gmra.mxu0 %vm63_vm2, %v47_v25 }
 0x136   :  { %v133_v30 = vpop.f32.mrf.mxu0 }
 0x137   :  { %v134_v31 = vadd.f32 %v267_v29, %v133_v30 }
 0x138   :  { %v317_v32 = vpop.f32.mrf.mxu0 }
 0x139   :  { %v137_v33 = vmax.f32 %v134_v31, 0.0 }
 0x13b   :  { %351 = vmatmul.mubr.f32.vlgmr.msra.gmra.mxu1 %v137_v33 }
 0x1fb   :  { %v227_v36 = vpop.f32.mrf.mxu1 }
 0x1fc   :  { %v228_v37 = vadd.f32 %v269_v35, %v227_v36 }
 0x1fd   :  { %v352_v38 = vpop.f32.mrf.mxu1 }
 0x1fe   :  { %232 = vrot.lane.b32.xlu0 %v228_v37, %s362_s19 }
 0x270   :  { %v233_v43 = vpop.permute.xlu0 %232 }
 0x271   :  { %v235_v44 = vsel %vm46_vm1, %v39_v41, %v233_v43 }
 0x272   :  { %v243_v45 = vmul.f32 %v270_v42, %v235_v44 }
 0x274   :  { %v244_v46 = vsel %vm63_vm2, %v243_v45, 0.0 }
 0x275   :  { %245 = vadd.xlane.f32.xlu1 %v244_v46 }
 0x2fe   :  { %v246_v48 = vpop.xlane.xlu1 %245 }
 0x2ff   :  { %v254_v49 = vadd.f32 %v271_v47, %v246_v48 }
 0x301   :  { %v272_v50 = vmul.f32 -1.442695, %v254_v49 }
 0x303   :  { %356 = vpow2.f32 %v272_v50 }
 0x310   :  { %v357_v51 = vpop.eup %356 }
 0x311   :  { %v258_v52 = vadd.f32 1.0, %v357_v51 }
 0x313   :  { %358 = vrcp.f32 %v258_v52 }
 0x320   :  { %v359_v53 = vpop.eup %358 }
 0x321   :  { %262 = vst.msk [vmem:[%s559_s10] sm:$0xff] %vm261_vm3, %v359_v53 }

</bundles_post_ra>
